<compile_context>
chip_gen: v7x
topology: tpu7x:2x2x1
jax: 0.10.0
libtpu: 0.0.40
codegen_flags: <defaults>
</compile_context>

<pallas_src>
import functools
import math

import jax
import jax.numpy as jnp
import numpy as np
from jax.experimental import pallas as pl
from jax.experimental.pallas import tpu as pltpu


def _perm_kernel(x_ref, bd_ref, o_ref, *, precision):
    """x_ref: (tm, W) rows; bd_ref: (W, W) block-diag permutation; o_ref: (tm, W)."""
    o_ref[...] = jnp.dot(
        x_ref[...],
        bd_ref[...],
        preferred_element_type=jnp.float32,
        precision=precision,
    ).astype(o_ref.dtype)


def _pallas_permute_rows(x_rows, bd):
    """Permute every aligned D-block of every row: out = x_rows @ kron(I_{W/D}, P)."""
    N, W = x_rows.shape
    dtype = x_rows.dtype
    itemsize = jnp.dtype(dtype).itemsize
    sub = max(8, 32 // itemsize)        # min sublane tile: f32=8, bf16=16, int8=32

    # Row tile: big enough (>= ~1 MiB blocks) to hit the HBM roofline, capped so the
    # double-buffered in+out blocks plus BD fit comfortably in scoped VMEM.
    tm_vmem_cap = max(sub, ((24 << 20) // (4 * W * itemsize)) // sub * sub)
    row_tile = min(2048, tm_vmem_cap)
    if N > row_tile:
        tm = row_tile                   # multiple of `sub`; ragged last block is masked
    elif N > sub:
        # Split into >= 2 parallel grid steps so v7x's second TensorCore gets work.
        tm = (((N + 1) // 2 + sub - 1) // sub) * sub
    else:
        tm = N                          # block == full array dim: legal for tiny N
    grid_m = pl.cdiv(N, tm)

    # Exact for f32 via HIGHEST; bf16 data with 0/1 weights is already exact at DEFAULT
    # (HIGHEST there would be ~6x wasted MXU work).
    precision = (jax.lax.Precision.HIGHEST if dtype == jnp.float32
                 else jax.lax.Precision.DEFAULT)

    vmem_limit = int(min(max((4 * tm * W + 2 * W * W) * itemsize + (4 << 20),
                             32 << 20), 64 << 20))
    cost = pl.CostEstimate(
        flops=2 * N * W * W,
        transcendentals=0,
        bytes_accessed=(2 * N * W + W * W) * itemsize,
    )

    return pl.pallas_call(
        functools.partial(_perm_kernel, precision=precision),
        out_shape=jax.ShapeDtypeStruct((N, W), dtype),
        grid_spec=pltpu.PrefetchScalarGridSpec(
            num_scalar_prefetch=0,
            grid=(grid_m,),
            in_specs=[
                pl.BlockSpec((tm, W), lambda i: (i, 0)),
                pl.BlockSpec((W, W), lambda i: (0, 0)),   # fetched once, VMEM-resident
            ],
            out_specs=pl.BlockSpec((tm, W), lambda i: (i, 0)),
        ),
        compiler_params=pltpu.CompilerParams(
            dimension_semantics=("parallel",),
            vmem_limit_bytes=vmem_limit,
        ),
        cost_estimate=cost,
    )(x_rows, bd)


@jax.jit
def _permute_call(x, bd):
    """x: (B, S, L); bd: (W, W) with W a multiple of D.  Applies P to every aligned
    D-block of the flattened stream — identical to the per-(B, S, L/D) gather."""
    B, S, L = x.shape
    W = bd.shape[0]
    total = B * S * L
    pad = (-total) % W
    xf = x.reshape(total)
    if pad:
        # TODO(synk): this ragged fallback costs one extra HBM pass for the pad/slice;
        # it is only taken when B*S*L is not a multiple of lcm(D, 128).
        xf = jnp.pad(xf, (0, pad))
    out_rows = _pallas_permute_rows(xf.reshape(-1, W), bd)
    out = out_rows.reshape(-1)
    if pad:
        out = out[:total]
    return out.reshape(B, S, L)


class PermutationLayer:
    """JAX/Pallas port of the PyTorch PermutationLayer (fixed perm chosen at init)."""

    def __init__(self, perm):
        self.index_1 = np.asarray(jax.device_get(perm)).astype(np.int64)
        self.state_dim = int(self.index_1.shape[0])
        self._bd_cache = {}            # (W, dtype name) -> device array, built once

    def _bd(self, W, dtype):
        key = (W, jnp.dtype(dtype).name)
        if key not in self._bd_cache:
            D = self.state_dim
            P = np.zeros((D, D), dtype=np.float32)
            P[self.index_1, np.arange(D)] = 1.0     # (row @ P)[j] == row[perm[j]]
            BD = np.kron(np.eye(W // D, dtype=np.float32), P)
            self._bd_cache[key] = jnp.asarray(BD, dtype=dtype)
        return self._bd_cache[key]

    def __call__(self, x):
        B, S, L = x.shape
        D = self.state_dim
        assert L % D == 0, "L must be a multiple of STATE_DIM"
        # Lane-dense width: multiple of both D (permutation period) and 128 (vreg lanes).
        W = math.lcm(D, 128)
        # TODO(synk): for pathological STATE_DIM where lcm(D, 128) is huge (>~4k), a
        # transposed D-minor layout with a (D, D) matmul would avoid the W^2 operand.
        return _permute_call(x, self._bd(W, x.dtype))


# ---------------- pure-JAX reference (PyTorch forward semantics) ----------------
def _ref_forward(x, perm):
    B, S, L = x.shape
    xr = x.reshape(B, S, -1, perm.shape[0])
    return xr[..., perm].reshape(B, S, L)


if __name__ == "__main__":
    B, S, L, STATE_DIM = 2, 8, 16, 4
    key = jax.random.PRNGKey(0)
    kx, kp = jax.random.split(key)

    x = jax.random.normal(kx, (B, S, L), jnp.float32)
    # Mirrors torch.randperm(STATE_DIM) captured at module init (deterministic here).
    perm = jax.random.permutation(kp, STATE_DIM)

    layer = PermutationLayer(perm)
    out = jax.block_until_ready(layer(x))

    ref = _ref_forward(x, jnp.asarray(perm))
    assert out.shape == (B, S, L)
    assert jnp.allclose(out, ref, atol=1e-6, rtol=1e-6), "mismatch vs reference"
    print("KERNEL_OK")
</pallas_src>

<mosaic_0001>
module attributes {stable_mosaic.version = 11 : i64} {
  func.func @_perm_kernel(%arg0: i32, %arg1: memref<2x128xf32, #tpu.memory_space<vmem>>, %arg2: memref<128x128xf32, #tpu.memory_space<vmem>>, %arg3: memref<2x128xf32, #tpu.memory_space<vmem>>) attributes {dimension_semantics = [#tpu.dimension_semantics<parallel>], iteration_bounds = array<i64: 1>, scalar_prefetch = 0 : i64, scratch_operands = 0 : i64, tpu.core_type = #tpu.core_type<tc>, window_params = [{transform_indices = @transform_0, window_bounds = array<i64: 2, 128>}, {pipeline_mode = #tpu.pipeline_mode<synchronous>, transform_indices = @transform_1, window_bounds = array<i64: 128, 128>}, {transform_indices = @transform_2, window_bounds = array<i64: 2, 128>}]} {
    %c0 = arith.constant 0 : index
    %c0_0 = arith.constant 0 : index
    %0 = vector.load %arg1[%c0, %c0_0] : memref<2x128xf32, #tpu.memory_space<vmem>>, vector<2x128xf32>
    %c0_1 = arith.constant 0 : index
    %c0_2 = arith.constant 0 : index
    %1 = vector.load %arg2[%c0_1, %c0_2] : memref<128x128xf32, #tpu.memory_space<vmem>>, vector<128x128xf32>
    %cst = arith.constant dense<0.000000e+00> : vector<2x128xf32>
    %2 = tpu.matmul %0, %1, %cst {dimension_numbers = #tpu.dot_dimension_numbers<[1], [0], [0], [1], [0, 0, 1, 1], [], []>, precision = #tpu.contract_precision<fp32>} : vector<2x128xf32>, vector<128x128xf32>, vector<2x128xf32> -> vector<2x128xf32>
    %c0_3 = arith.constant 0 : index
    %c0_4 = arith.constant 0 : index
    %3 = vector.load %arg3[%c0_3, %c0_4] : memref<2x128xf32, #tpu.memory_space<vmem>>, vector<2x128xf32>
    tpu.vector_store %arg3[%c0_3, %c0_4], %2 {strides = array<i32>} : memref<2x128xf32, #tpu.memory_space<vmem>>, vector<2x128xf32>,
    return
  }
  func.func @transform_0(%arg0: i32) -> (i32, i32) {
    %c0_i32 = arith.constant 0 : i32
    %c0_i32_0 = arith.constant 0 : i32
    return %arg0, %c0_i32 : i32, i32
  }
  func.func @transform_1(%arg0: i32) -> (i32, i32) {
    %c0_i32 = arith.constant 0 : i32
    %c0_i32_0 = arith.constant 0 : i32
    %c0_i32_1 = arith.constant 0 : i32
    return %c0_i32, %c0_i32_0 : i32, i32
  }
  func.func @transform_2(%arg0: i32) -> (i32, i32) {
    %c0_i32 = arith.constant 0 : i32
    %c0_i32_0 = arith.constant 0 : i32
    return %arg0, %c0_i32 : i32, i32
  }
}

</mosaic_0001>

<bundles_post_ra>
// kernel: _permute_call.1
= control target key start
LH: loop header
LB: loop body
LE: loop exit
PB: predicated region body
PF: predicated region fallthrough
CT: control target
= control target key end

     0   :  { %7 = vsyncpa [#allocation3], 0  ;;  %s1184_s9 = smov [#allocation2]   ;;  %s1470_s0 = inlined_call_operand.vmem [shape: f32[2,128], index: 0, kind: input, shape index: {}]   ;;  %s1471_s1 = inlined_call_operand.hbm [shape: f32[128,128], index: 1, kind: input, shape index: {}]   ;;  %s1472_s2 = inlined_call_operand.vmem [shape: f32[2,128], index: 2, kind: output, shape index: {}]  }
   0x1   :  { %s15_s10 = sshll.u32 %s1184_s9, 4  ;;  %s1160_s13 = scalar_lea.hbm %s1471_s1, 2048  ;;  %s16_s10 = int_to_ptr.vmem [resolvable:$true] %s15_s10 }
   0x2   :  { %p1161_p0 = scmp.ne.s32.totalorder %s1471_s1, %s1160_s13  ;;  %p1164_p1 = scmp.lt.u32.totalorder %s1160_s13, %s1471_s1 }
   0x4   :  { %p1166_p2 = pnand %p1164_p1, %p1161_p0 }
   0x6   :  { %1169 = shalt.err (!%p1166_p2)
}
   0x7   :  { %s1170_s18 = scalar_lea.vmem %s16_s10, 2048  ;;  %p1175_p4 = scmp.lt.s32.totalorder %s16_s10, %s16_s10 }
   0x8   :  { %p1171_p3 = scmp.ne.s32.totalorder %s16_s10, %s1170_s18  ;;  %p1176_p5 = scmp.lt.s32.totalorder %s1170_s18, %s1170_s18 }
   0xa   :  { %p1177_p6 = por %p1176_p5, %p1175_p4 }
   0xc   :  { %p1178_p7 = pnand %p1177_p6, %p1171_p3 }
   0xe   :  { %1181 = shalt.err (!%p1178_p7)
}
   0xf   :  { %s1185_s19 = smov 128   ;;  %s1186_s20 = smov 8  }
  0x10   :  { %21 = dma.hbm_to_vmem [thread:$0]  %s1471_s1, 2048, %s16_s10, [#allocation3], %s1185_s19, %s1185_s19, %s1186_s20  }
  0x11   :  { %1182 = dma.done.wait [#allocation3], 2048  }
  0x12   :  { %1183 = vsyncadd [#allocation3], 4294965248  ;;  %v1187_v0 = vmov 0.0|0.0   ;;  %vm1188_vm0 = vmmov 0   ;;  %v1189_v1 = vmov 0.0   ;;  %v26_v2 = vld [vmem:[#allocation2] sm:$0xff] }
  0x13   :  { %1001 = vmatprep.subr.bf16.mxu1 %v1187_v0  ;;  %1073 = vmatprep.subr.bf16.mxu0 %v1187_v0  ;;  %v27_v3 = vld [vmem:[#allocation2 + $0x8] sm:$0xff]  ;;  %v28_v4 = vld [vmem:[#allocation2 + $0x10] sm:$0xff]  ;;  %v43_v5 = vand.u32 4294901760, %v26_v2  ;;  %v29_v7 = vld [vmem:[#allocation2 + $0x18] sm:$0xff] }
  0x14   :  { %823 = vmatprep.mubr.msk.f32.mxu1 %vm1188_vm0, %v1189_v1  ;;  %928 = vmatprep.mubr.msk.f32.mxu0 %vm1188_vm0, %v1189_v1  ;;  %v46_v6 = vand.u32 4294901760, %v27_v3  ;;  %v49_v8 = vand.u32 4294901760, %v28_v4  ;;  %v52_v9 = vand.u32 4294901760, %v29_v7  ;;  %v30_v10 = vld [vmem:[#allocation2 + $0x20] sm:$0xff]  ;;  %v31_v11 = vld [vmem:[#allocation2 + $0x28] sm:$0xff]  ;;  %v32_v16 = vld [vmem:[#allocation2 + $0x30] sm:$0xff] }
  0x15   :  { %v55_v14 = vand.u32 4294901760, %v30_v10  ;;  %v58_v15 = vand.u32 4294901760, %v31_v11  ;;  %v33_v17 = vld [vmem:[#allocation2 + $0x38] sm:$0xff]  ;;  %v61_v19 = vand.u32 4294901760, %v32_v16  ;;  %v1237_v21 = vld [vmem:[#allocation2 + $0x40] sm:$0xff]  ;;  %v1239_v22 = vld [vmem:[#allocation2 + $0x48] sm:$0xff]  ;;  %v1256_v29 = vsub.f32 %v26_v2, %v43_v5 }
  0x16   :  { %v1223_v12 = vpack.c.bf16 %v46_v6, %v43_v5  ;;  %v1227_v13 = vpack.c.bf16 %v52_v9, %v49_v8  ;;  %v64_v20 = vand.u32 4294901760, %v33_v17  ;;  %v67_v24 = vand.u32 4294901760, %v1237_v21  ;;  %v25_v26 = vld [vmem:[%s1470_s0] sm:$0x3]  ;;  %v1252_v27 = vld [vmem:[#allocation2 + $0x50] sm:$0xff]  ;;  %v1254_v28 = vld [vmem:[#allocation2 + $0x58] sm:$0xff] }
  0x17   :  { %v1233_v18 = vpack.c.bf16 %v58_v15, %v55_v14  ;;  %v70_v25 = vand.u32 4294901760, %v1239_v22  ;;  %v1258_v30 = vand.u32 4294901760, %v25_v26  ;;  %v1260_v31 = vsub.f32 %v27_v3, %v46_v6  ;;  %v1268_v35 = vld [vmem:[#allocation2 + $0x60] sm:$0xff]  ;;  %v1272_v36 = vld [vmem:[#allocation2 + $0x68] sm:$0xff]  ;;  %v1291_v43 = vld [vmem:[#allocation2 + $0x70] sm:$0xff] }
  0x18   :  { %1003 = vmatpush3.bf16.msra.mxu1 %v1223_v12  ;;  %1075 = vmatpush3.bf16.msra.mxu0 %v1223_v12  ;;  %v1243_v23 = vpack.c.bf16 %v64_v20, %v61_v19  ;;  %v73_v33 = vand.u32 4294901760, %v1252_v27  ;;  %v76_v34 = vand.u32 4294901760, %v1254_v28  ;;  %v1274_v37 = vsub.f32 %v28_v4, %v49_v8  ;;  %v1293_v44 = vld [vmem:[#allocation2 + $0x78] sm:$0xff] }
  0x19   :  { %1004 = vmatprep.subr.bf16.mxu1 %v1187_v0  ;;  %1076 = vmatprep.subr.bf16.mxu0 %v1187_v0  ;;  %v1264_v32 = vpack.c.bf16 %v70_v25, %v67_v24  ;;  %v1276_v38 = vsub.f32 %v29_v7, %v52_v9  ;;  %v79_v39 = vand.u32 4294901760, %v1268_v35  ;;  %v1280_v40 = vsub.f32 %v25_v26, %v1258_v30 }
  0x1a   :  { %v1288_v41 = vpack.c.bf16 %v76_v34, %v73_v33  ;;  %v82_v42 = vand.u32 4294901760, %v1272_v36  ;;  %v136_v45 = vand.u32 4294901760, %v1256_v29  ;;  %v143_v46 = vand.u32 4294901760, %v1260_v31 }
  0x1b   :  { %v1299_v47 = vsub.f32 %v30_v10, %v55_v14  ;;  %v1301_v48 = vsub.f32 %v31_v11, %v58_v15  ;;  %v85_v49 = vand.u32 4294901760, %v1291_v43  ;;  %v88_v50 = vand.u32 4294901760, %v1293_v44 }
  0x1c   :  { %1006 = vmatpush3.bf16.msra.mxu1 %v1227_v13  ;;  %1078 = vmatpush3.bf16.msra.mxu0 %v1227_v13  ;;  %v125_v51 = vand.u32 4294901760, %v1280_v40  ;;  %v150_v52 = vand.u32 4294901760, %v1274_v37  ;;  %v1313_v53 = vpack.c.bf16 %v82_v42, %v79_v39  ;;  %v137_v54 = vsub.f32 %v1256_v29, %v136_v45 }
  0x1d   :  { %1007 = vmatprep.subr.bf16.mxu1 %v1187_v0  ;;  %1079 = vmatprep.subr.bf16.mxu0 %v1187_v0  ;;  %v144_v55 = vsub.f32 %v1260_v31, %v143_v46  ;;  %v157_v56 = vand.u32 4294901760, %v1276_v38  ;;  %v1320_v57 = vsub.f32 %v32_v16, %v61_v19  ;;  %v1322_v58 = vsub.f32 %v33_v17, %v64_v20 }
  0x1e   :  { %v126_v59 = vsub.f32 %v1280_v40, %v125_v51  ;;  %v151_v60 = vsub.f32 %v1274_v37, %v150_v52  ;;  %v164_v61 = vand.u32 4294901760, %v1299_v47  ;;  %v171_v62 = vand.u32 4294901760, %v1301_v48 }
  0x1f   :  { %v1334_v63 = vpack.c.bf16 %v88_v50, %v85_v49  ;;  %v138_v2 = vand.u32 4294901760, %v137_v54  ;;  %v145_v3 = vand.u32 4294901760, %v144_v55  ;;  %v158_v4 = vsub.f32 %v1276_v38, %v157_v56 }
  0x20   :  { %1009 = vmatpush3.bf16.msra.mxu1 %v1233_v18  ;;  %1081 = vmatpush3.bf16.msra.mxu0 %v1233_v18  ;;  %v1340_v5 = vsub.f32 %v1237_v21, %v67_v24  ;;  %v1343_v6 = vsub.f32 %v1239_v22, %v70_v25  ;;  %v1098_v7 = vpack.c.bf16 %v143_v46, %v136_v45  ;;  %v127_v8 = vand.u32 4294901760, %v126_v59 }
  0x21   :  { %1010 = vmatprep.subr.bf16.mxu1 %v1187_v0  ;;  %1082 = vmatprep.subr.bf16.mxu0 %v1187_v0  ;;  %v152_v9 = vand.u32 4294901760, %v151_v60  ;;  %v165_v10 = vsub.f32 %v1299_v47, %v164_v61  ;;  %v172_v11 = vsub.f32 %v1301_v48, %v171_v62  ;;  %v1026_v14 = vpack.c.bf16 %v145_v3, %v138_v2 }
  0x22   :  { %v159_v15 = vand.u32 4294901760, %v158_v4  ;;  %v178_v16 = vand.u32 4294901760, %v1320_v57  ;;  %v185_v17 = vand.u32 4294901760, %v1322_v58  ;;  %v1356_v19 = vsub.f32 %v1252_v27, %v73_v33 }
  0x23   :  { %v1361_v20 = vsub.f32 %v1254_v28, %v76_v34  ;;  %v1101_v21 = vpack.c.bf16 %v157_v56, %v150_v52  ;;  %v166_v22 = vand.u32 4294901760, %v165_v10  ;;  %v173_v24 = vand.u32 4294901760, %v172_v11 }
  0x24   :  { %1012 = vmatpush3.bf16.msra.mxu1 %v1243_v23  ;;  %1084 = vmatpush3.bf16.msra.mxu0 %v1243_v23  ;;  %v192_v25 = vand.u32 4294901760, %v1340_v5  ;;  %v1029_v26 = vpack.c.bf16 %v159_v15, %v152_v9  ;;  %v179_v45 = vsub.f32 %v1320_v57, %v178_v16  ;;  %v186_v27 = vsub.f32 %v1322_v58, %v185_v17 }
  0x25   :  { %1013 = vmatprep.subr.bf16.mxu1 %v1187_v0  ;;  %1085 = vmatprep.subr.bf16.mxu0 %v1187_v0  ;;  %v199_v33 = vand.u32 4294901760, %v1343_v6  ;;  %v1372_v28 = vsub.f32 %v1268_v35, %v79_v39  ;;  %v1377_v34 = vsub.f32 %v1272_v36, %v82_v42  ;;  %v1032_v46 = vpack.c.bf16 %v173_v24, %v166_v22 }
  0x26   :  { %v193_v52 = vsub.f32 %v1340_v5, %v192_v25  ;;  %v206_v54 = vand.u32 4294901760, %v1356_v19  ;;  %v180_v35 = vand.u32 4294901760, %v179_v45  ;;  %v187_v39 = vand.u32 4294901760, %v186_v27 }
  0x27   :  { %v200_v55 = vsub.f32 %v1343_v6, %v199_v33  ;;  %v213_v36 = vand.u32 4294901760, %v1361_v20  ;;  %v1392_v42 = vsub.f32 %v1291_v43, %v85_v49  ;;  %v1397_v56 = vsub.f32 %v1293_v44, %v88_v50 }
  0x28   :  { %1015 = vmatpush3.bf16.msra.mxu1 %v1264_v32  ;;  %1087 = vmatpush3.bf16.msra.mxu0 %v1264_v32  ;;  %v1107_v59 = vpack.c.bf16 %v185_v17, %v178_v16  ;;  %v194_v60 = vand.u32 4294901760, %v193_v52  ;;  %v1035_v2 = vpack.c.bf16 %v187_v39, %v180_v35  ;;  %v227_v43 = vand.u32 4294901760, %v1377_v34 }
  0x29   :  { %1016 = vmatprep.subr.bf16.mxu1 %v1187_v0  ;;  %1088 = vmatprep.subr.bf16.mxu0 %v1187_v0  ;;  %v201_v3 = vand.u32 4294901760, %v200_v55  ;;  %v214_v4 = vsub.f32 %v1361_v20, %v213_v36  ;;  %v1110_v44 = vpack.c.bf16 %v199_v33, %v192_v25  ;;  %v241_v11 = vand.u32 4294901760, %v1397_v56 }
  0x2a   :  { %v228_v10 = vsub.f32 %v1377_v34, %v227_v43 }
  0x2b   :  { %v215_v9 = vand.u32 4294901760, %v214_v4  ;;  %v242_v22 = vsub.f32 %v1397_v56, %v241_v11 }
  0x2c   :  { %1018 = vmatpush3.bf16.msra.mxu1 %v1288_v41  ;;  %1090 = vmatpush3.bf16.msra.mxu0 %v1288_v41  ;;  %v229_v17 = vand.u32 4294901760, %v228_v10 }
  0x2d   :  { %1019 = vmatprep.subr.bf16.mxu1 %v1187_v0  ;;  %1091 = vmatprep.subr.bf16.mxu0 %v1187_v0  ;;  %v243_v45 = vand.u32 4294901760, %v242_v22 }
  0x30   :  { %1021 = vmatpush3.bf16.msra.mxu1 %v1313_v53  ;;  %1093 = vmatpush3.bf16.msra.mxu0 %v1313_v53 }
  0x31   :  { %1022 = vmatprep.subr.bf16.mxu1 %v1187_v0  ;;  %1094 = vmatprep.subr.bf16.mxu0 %v1187_v0 }
  0x34   :  { %1024 = vmatpush3.bf16.msra.mxu1 %v1334_v63  ;;  %1096 = vmatpush3.bf16.msra.mxu0 %v1334_v63 }
  0x35   :  { %1025 = vmatprep.subr.bf16.mxu1 %v1187_v0  ;;  %1097 = vmatprep.subr.bf16.mxu0 %v1187_v0 }
  0x37   :  { %824 = vmatmul.mubr.f32.vlgmr.msra.gmra.mrb[0].mxu1 %v127_v8  ;;  %929 = vmatmul.mubr.f32.vlgmr.msra.gmra.mrb[0].mxu0 %v125_v51  ;;  %v1104_v51 = vpack.c.bf16 %v171_v62, %v164_v61  ;;  %v207_v61 = vsub.f32 %v1356_v19, %v206_v54  ;;  %v220_v62 = vand.u32 4294901760, %v1372_v28  ;;  %v1038_v8 = vpack.c.bf16 %v201_v3, %v194_v60 }
  0x38   :  { %1027 = vmatpush3.bf16.msra.mxu1 %v1026_v14  ;;  %1099 = vmatpush3.bf16.msra.mxu0 %v1098_v7  ;;  %v234_v7 = vand.u32 4294901760, %v1392_v42  ;;  %v1113_v14 = vpack.c.bf16 %v213_v36, %v206_v54 }
  0x39   :  { %1028 = vmatprep.subr.bf16.mxu1 %v1187_v0  ;;  %1100 = vmatprep.subr.bf16.mxu0 %v1187_v0  ;;  %v208_v49 = vand.u32 4294901760, %v207_v61  ;;  %v221_v50 = vsub.f32 %v1372_v28, %v220_v62  ;;  %v1116_v25 = vpack.c.bf16 %v227_v43, %v220_v62 }
  0x3a   :  { %858 = vmatprep.mubr.msk.f32.mxu1 %vm1188_vm0, %v1189_v1  ;;  %963 = vmatprep.mubr.msk.f32.mxu0 %vm1188_vm0, %v1189_v1  ;;  %v1119_v33 = vpack.c.bf16 %v241_v11, %v234_v7 }
  0x3b   :  { %v222_v15 = vand.u32 4294901760, %v221_v50  ;;  %v1041_v16 = vpack.c.bf16 %v215_v9, %v208_v49 }
  0x3c   :  { %1030 = vmatpush3.bf16.msra.mxu1 %v1029_v26  ;;  %1102 = vmatpush3.bf16.msra.mxu0 %v1101_v21  ;;  %v235_v21 = vsub.f32 %v1392_v42, %v234_v7 }
  0x3d   :  { %1031 = vmatprep.subr.bf16.mxu1 %v1187_v0  ;;  %1103 = vmatprep.subr.bf16.mxu0 %v1187_v0  ;;  %v1044_v24 = vpack.c.bf16 %v229_v17, %v222_v15 }
  0x3e   :  { %v236_v26 = vand.u32 4294901760, %v235_v21 }
  0x40   :  { %1033 = vmatpush3.bf16.msra.mxu1 %v1032_v46  ;;  %1105 = vmatpush3.bf16.msra.mxu0 %v1104_v51  ;;  %v1047_v27 = vpack.c.bf16 %v243_v45, %v236_v26  ;;  %v1050_v46 = vpack.c.bf16 %v1260_v31, %v1256_v29  ;;  %v1053_v51 = vpack.c.bf16 %v1276_v38, %v1274_v37 }
  0x41   :  { %1034 = vmatprep.subr.bf16.mxu1 %v1187_v0  ;;  %1106 = vmatprep.subr.bf16.mxu0 %v1187_v0  ;;  %v1056_v29 = vpack.c.bf16 %v1301_v48, %v1299_v47 }
  0x44   :  { %1036 = vmatpush3.bf16.msra.mxu1 %v1035_v2  ;;  %1108 = vmatpush3.bf16.msra.mxu0 %v1107_v59 }
  0x45   :  { %1037 = vmatprep.subr.bf16.mxu1 %v1187_v0  ;;  %1109 = vmatprep.subr.bf16.mxu0 %v1187_v0 }
  0x48   :  { %1039 = vmatpush3.bf16.msra.mxu1 %v1038_v8  ;;  %1111 = vmatpush3.bf16.msra.mxu0 %v1110_v44 }
  0x49   :  { %1040 = vmatprep.subr.bf16.mxu1 %v1187_v0  ;;  %1112 = vmatprep.subr.bf16.mxu0 %v1187_v0 }
  0x4c   :  { %1042 = vmatpush3.bf16.msra.mxu1 %v1041_v16  ;;  %1114 = vmatpush3.bf16.msra.mxu0 %v1113_v14 }
  0x4d   :  { %1043 = vmatprep.subr.bf16.mxu1 %v1187_v0  ;;  %1115 = vmatprep.subr.bf16.mxu0 %v1187_v0 }
  0x50   :  { %1045 = vmatpush3.bf16.msra.mxu1 %v1044_v24  ;;  %1117 = vmatpush3.bf16.msra.mxu0 %v1116_v25 }
  0x51   :  { %1046 = vmatprep.subr.bf16.mxu1 %v1187_v0  ;;  %1118 = vmatprep.subr.bf16.mxu0 %v1187_v0 }
  0x54   :  { %1048 = vmatpush3.bf16.msra.mxu1 %v1047_v27  ;;  %1120 = vmatpush3.bf16.msra.mxu0 %v1119_v33 }
  0x55   :  { %1049 = vmatprep.subr.bf16.mxu1 %v1187_v0  ;;  %1121 = vmatprep.subr.bf16.mxu0 %v1187_v0 }
  0x57   :  { %859 = vmatmul.mubr.f32.vlgmr.msra.gmra.mrb[0].mxu1 %v1258_v30  ;;  %964 = vmatmul.mubr.f32.vlgmr.msra.gmra.mrb[0].mxu0 %v1258_v30 }
  0x58   :  { %1051 = vmatpush3.bf16.msra.mxu1 %v1050_v46  ;;  %1123 = vmatpush3.bf16.msra.mxu0 %v1223_v12  ;;  %v1059_v12 = vpack.c.bf16 %v1322_v58, %v1320_v57 }
  0x59   :  { %1052 = vmatprep.subr.bf16.mxu1 %v1187_v0  ;;  %1124 = vmatprep.subr.bf16.mxu0 %v1187_v0 }
  0x5a   :  { %893 = vmatprep.mubr.msk.f32.mxu1 %vm1188_vm0, %v1189_v1  ;;  %998 = vmatprep.mubr.msk.f32.mxu0 %vm1188_vm0, %v1189_v1  ;;  %v1062_v1 = vpack.c.bf16 %v1343_v6, %v1340_v5 }
  0x5c   :  { %1054 = vmatpush3.bf16.msra.mxu1 %v1053_v51  ;;  %1126 = vmatpush3.bf16.msra.mxu0 %v1227_v13  ;;  %v1065_v13 = vpack.c.bf16 %v1361_v20, %v1356_v19 }
  0x5d   :  { %1055 = vmatprep.subr.bf16.mxu1 %v1187_v0  ;;  %1127 = vmatprep.subr.bf16.mxu0 %v1187_v0 }
  0x60   :  { %1057 = vmatpush3.bf16.msra.mxu1 %v1056_v29  ;;  %1129 = vmatpush3.bf16.msra.mxu0 %v1233_v18  ;;  %v1068_v18 = vpack.c.bf16 %v1377_v34, %v1372_v28 }
  0x61   :  { %1058 = vmatprep.subr.bf16.mxu1 %v1187_v0  ;;  %1130 = vmatprep.subr.bf16.mxu0 %v1187_v0 }
  0x64   :  { %1060 = vmatpush3.bf16.msra.mxu1 %v1059_v12  ;;  %1132 = vmatpush3.bf16.msra.mxu0 %v1243_v23  ;;  %v1071_v23 = vpack.c.bf16 %v1397_v56, %v1392_v42 }
  0x65   :  { %1061 = vmatprep.subr.bf16.mxu1 %v1187_v0  ;;  %1133 = vmatprep.subr.bf16.mxu0 %v1187_v0 }
  0x68   :  { %1063 = vmatpush3.bf16.msra.mxu1 %v1062_v1  ;;  %1135 = vmatpush3.bf16.msra.mxu0 %v1264_v32 }
  0x69   :  { %1064 = vmatprep.subr.bf16.mxu1 %v1187_v0  ;;  %1136 = vmatprep.subr.bf16.mxu0 %v1187_v0 }
  0x6c   :  { %1066 = vmatpush3.bf16.msra.mxu1 %v1065_v13  ;;  %1138 = vmatpush3.bf16.msra.mxu0 %v1288_v41 }
  0x6d   :  { %1067 = vmatprep.subr.bf16.mxu1 %v1187_v0  ;;  %1139 = vmatprep.subr.bf16.mxu0 %v1187_v0 }
  0x70   :  { %1069 = vmatpush3.bf16.msra.mxu1 %v1068_v18  ;;  %1141 = vmatpush3.bf16.msra.mxu0 %v1313_v53 }
  0x71   :  { %1070 = vmatprep.subr.bf16.mxu1 %v1187_v0  ;;  %1142 = vmatprep.subr.bf16.mxu0 %v1187_v0 }
  0x74   :  { %1072 = vmatpush3.bf16.msra.mxu1 %v1071_v23  ;;  %1144 = vmatpush3.bf16.msra.mxu0 %v1334_v63 }
  0x77   :  { %894 = vmatmul.mubr.f32.vlgmr.msra.gmra.mrb[0].mxu1 %v1280_v40  ;;  %999 = vmatmul.mubr.f32.vlgmr.msra.gmra.mrb[0].mxu0 %v1258_v30 }
 0x14a   :  { %v384_v31 = vpop.f32.mrb[0].mxu1  ;;  %v679_v32 = vpop.f32.mrb[0].mxu0 }
 0x14b   :  { %v1145_v37 = vadd.f32 %v679_v32, %v384_v31  ;;  %v895_v38 = vpop.f32.mrb[1].mxu1  ;;  %v1000_v41 = vpop.f32.mrb[1].mxu0 }
 0x14d   :  { %683 = vst [vmem:[%s1472_s2] sm:$0x3] %v1145_v37 }
 0x14e   :  { %688 = vsyncpa [#allocation3], 1 }

</bundles_post_ra>
